<compile_context>
chip_gen: v7x
topology: tpu7x:2x2x1
jax: 0.10.0
libtpu: 0.0.40
codegen_flags: <defaults>
</compile_context>

<pallas_src>
import functools
import math

import jax
import jax.numpy as jnp
from jax.experimental import pallas as pl
from jax.experimental.pallas import tpu as pltpu

LANE = 128


def _round_up(x, m):
    return ((x + m - 1) // m) * m


# -----------------------------------------------------------------------------
# Fused Pallas kernel: whole MLP stack in one call, activation kept in vregs
# -----------------------------------------------------------------------------
def _fused_mlp_kernel(x_ref, w_ref, v_ref, o_ref, *,
                      num_layers, use_bn, eps, neg_slope):
    # x_ref : (N, C_in0)          unpadded input (full-array VMEM block)
    # w_ref : (L, C_pad, C_pad)   bf16, zero-padded, pre-transposed weights
    # v_ref : (L, n_vec, C_pad)   f32  [bias] or [bias, gamma, beta]
    # o_ref : (N, C_out_last)     unpadded output (full-array VMEM block)
    act = x_ref[...].astype(jnp.float32)            # (N, k) f32, lives in vregs

    for l in range(num_layers):                     # static unroll over layers
        k_in = act.shape[1]
        # Layer 0 contracts over the true input width (no activation padding);
        # later layers contract over the full padded width, whose extra
        # columns are exactly zero.
        w = w_ref[l, :k_in, :]                      # (k_in, C_pad) bf16
        vec = v_ref[l]                              # (n_vec, C_pad) f32
        b = vec[0:1, :]                             # (1, C_pad)

        # Linear on the MXU: bf16 x bf16 -> f32 accumulation.
        y = jnp.dot(act.astype(jnp.bfloat16), w,
                    preferred_element_type=jnp.float32) + b

        # LeakyReLU(negative_slope=0.2)
        y = jnp.where(y >= 0.0, y, neg_slope * y)

        if use_bn:
            # BatchNorm1d, training mode: batch mean / biased variance, affine
            # folded into a single (1, C_pad) scale.
            gamma = vec[1:2, :]
            beta = vec[2:3, :]
            mean = jnp.mean(y, axis=0, keepdims=True)
            diff = y - mean
            var = jnp.mean(diff * diff, axis=0, keepdims=True)
            scale = gamma * jax.lax.rsqrt(var + eps)   # (1, C_pad) only
            y = diff * scale + beta

        act = y                                     # stays in vregs

    # Single store of the real output columns (no wrapper-side slice needed).
    o_ref[...] = act[:, : o_ref.shape[1]].astype(o_ref.dtype)


def fused_mlp(x, w_stack, v_stack, *, use_bn, out_features,
              eps=1e-5, neg_slope=0.2):
    """Run the whole MLP stack in one Pallas call.

    x        : (N, C_in0)          unpadded input
    w_stack  : (L, C_pad, C_pad)   bf16, zero-padded, pre-transposed weights
    v_stack  : (L, n_vec, C_pad)   f32 stacked [bias] or [bias, gamma, beta]
    Returns (N, out_features).
    """
    n, c_in = x.shape
    num_layers, c_pad, _ = w_stack.shape

    kernel = functools.partial(
        _fused_mlp_kernel, num_layers=num_layers, use_bn=use_bn,
        eps=eps, neg_slope=neg_slope)

    flops = 2 * n * c_pad * (c_in + (num_layers - 1) * c_pad)
    bytes_accessed = (x.size * x.dtype.itemsize
                      + w_stack.size * w_stack.dtype.itemsize
                      + v_stack.size * v_stack.dtype.itemsize
                      + n * out_features * x.dtype.itemsize)
    transcendentals = num_layers * c_pad if use_bn else 0

    return pl.pallas_call(
        kernel,
        out_shape=jax.ShapeDtypeStruct((n, out_features), x.dtype),
        # No grid: single block, whole (small) arrays resident in VMEM.
        in_specs=[
            pl.BlockSpec(memory_space=pltpu.MemorySpace.VMEM),   # x
            pl.BlockSpec(memory_space=pltpu.MemorySpace.VMEM),   # w_stack
            pl.BlockSpec(memory_space=pltpu.MemorySpace.VMEM),   # v_stack
        ],
        out_specs=pl.BlockSpec(memory_space=pltpu.MemorySpace.VMEM),
        cost_estimate=pl.CostEstimate(
            flops=flops,
            transcendentals=transcendentals,
            bytes_accessed=bytes_accessed),
    )(x, w_stack, v_stack)


# -----------------------------------------------------------------------------
# Parameter construction (xavier_uniform_ weights, nn.Linear bias init, BN
# gamma=1 / beta=0).  Returns bf16 padded stacks for the kernel plus the raw
# f32 per-layer params for the pure-JAX reference.
# -----------------------------------------------------------------------------
def init_params(key, channels, c_pad):
    num_layers = len(channels) - 1

    def one_stack(key, with_bn):
        n_vec = 3 if with_bn else 1
        w_stack = jnp.zeros((num_layers, c_pad, c_pad), jnp.float32)
        v_stack = jnp.zeros((num_layers, n_vec, c_pad), jnp.float32)
        raw = []
        for i in range(num_layers):
            c_in, c_out = channels[i], channels[i + 1]
            key, kw, kb = jax.random.split(key, 3)
            limit = math.sqrt(6.0 / (c_in + c_out))            # xavier_uniform_
            w = jax.random.uniform(kw, (c_in, c_out), jnp.float32, -limit, limit)
            b_bound = 1.0 / math.sqrt(c_in)                    # nn.Linear bias init
            b = jax.random.uniform(kb, (c_out,), jnp.float32, -b_bound, b_bound)
            gamma = jnp.ones((c_out,), jnp.float32)            # nn.init.ones_
            beta = jnp.zeros((c_out,), jnp.float32)

            w_stack = w_stack.at[i, :c_in, :c_out].set(w)
            v_stack = v_stack.at[i, 0, :c_out].set(b)
            if with_bn:
                v_stack = v_stack.at[i, 1, :c_out].set(gamma)
                # beta row stays zero
            raw.append((w, b, gamma, beta))
        # bf16 weight storage: halves weight DMA / VMEM, feeds the MXU natively.
        # Zero padding is exact in bf16.  bias/gamma/beta stay f32.
        return key, (w_stack.astype(jnp.bfloat16), v_stack, raw)

    # Separate ModuleLists in the original => separate weights per stack.
    key, bn_pack = one_stack(key, with_bn=True)
    key, nobn_pack = one_stack(key, with_bn=False)
    return bn_pack, nobn_pack


def mlp_forward(x, bn_pack, nobn_pack, channels):
    # Mirrors: `if len(x) == 1: use mlpNoBNmodules else: use mlpmodules`
    # (dispatch is static on the batch size, as in the original).
    if x.shape[0] == 1:
        w_stack, v_stack, _ = nobn_pack
        use_bn = False
    else:
        w_stack, v_stack, _ = bn_pack
        use_bn = True
    return fused_mlp(x, w_stack, v_stack, use_bn=use_bn,
                     out_features=channels[-1])


# -----------------------------------------------------------------------------
# Pure-JAX reference (correctness check).
#   quantized=True  : same bf16 weight / matmul-operand rounding as the kernel
#                     (tight check of the kernel's structure / BN / slicing).
#   quantized=False : faithful f32 PyTorch forward (loose check; the only
#                     difference is the deliberate bf16 weight storage).
# -----------------------------------------------------------------------------
def mlp_reference(x, raw_params, use_bn, *, eps=1e-5, neg_slope=0.2,
                  quantized=False):
    for (w, b, gamma, beta) in raw_params:
        if quantized:
            y = jnp.dot(x.astype(jnp.bfloat16), w.astype(jnp.bfloat16),
                        preferred_element_type=jnp.float32) + b
        else:
            y = x @ w + b
        y = jnp.where(y >= 0.0, y, neg_slope * y)
        if use_bn:
            mean = jnp.mean(y, axis=0, keepdims=True)
            var = jnp.mean((y - mean) ** 2, axis=0, keepdims=True)
            y = (y - mean) / jnp.sqrt(var + eps) * gamma + beta
        x = y
    return x


if __name__ == "__main__":
    channels = [16, 32, 8]          # MLP(channels=[16, 32, 8]) -> 2 fused layers
    batch = 8
    c_pad = _round_up(max(max(channels), LANE), LANE)   # -> 128 (lane-dense)

    key = jax.random.PRNGKey(0)
    key, kx = jax.random.split(key)
    x = jax.random.normal(kx, (batch, channels[0]), jnp.float32)

    bn_pack, nobn_pack = init_params(key, channels, c_pad)

    # batch > 1 path: Linear + LeakyReLU + BatchNorm1d (batch statistics)
    out = jax.block_until_ready(mlp_forward(x, bn_pack, nobn_pack, channels))

    # batch == 1 path: Linear + LeakyReLU only (separate weights, bias-only DMA)
    x1 = x[:1]
    out1 = jax.block_until_ready(mlp_forward(x1, bn_pack, nobn_pack, channels))

    # References
    ref_q = mlp_reference(x, bn_pack[2], True, quantized=True)
    ref_f = mlp_reference(x, bn_pack[2], True, quantized=False)
    ref1_q = mlp_reference(x1, nobn_pack[2], False, quantized=True)
    ref1_f = mlp_reference(x1, nobn_pack[2], False, quantized=False)

    assert out.shape == (batch, channels[-1])
    assert out1.shape == (1, channels[-1])
    # Tight check against the bf16-weight reference (kernel-logic correctness).
    assert jnp.allclose(out, ref_q, atol=1e-2, rtol=1e-2), \
        float(jnp.max(jnp.abs(out - ref_q)))
    assert jnp.allclose(out1, ref1_q, atol=1e-2, rtol=1e-2), \
        float(jnp.max(jnp.abs(out1 - ref1_q)))
    # Loose check against the faithful f32 forward (bf16 weight rounding only).
    assert jnp.allclose(out, ref_f, atol=1.5e-1, rtol=1.5e-1), \
        float(jnp.max(jnp.abs(out - ref_f)))
    assert jnp.allclose(out1, ref1_f, atol=1.5e-1, rtol=1.5e-1), \
        float(jnp.max(jnp.abs(out1 - ref1_f)))

    print("KERNEL_OK")
</pallas_src>

<mosaic_0001>
module attributes {stable_mosaic.version = 11 : i64} {
  func.func @_fused_mlp_kernel(%arg0: memref<8x16xf32, #tpu.memory_space<vmem>>, %arg1: memref<2x128x128xbf16, #tpu.memory_space<vmem>>, %arg2: memref<2x3x128xf32, #tpu.memory_space<vmem>>, %arg3: memref<8x8xf32, #tpu.memory_space<vmem>>) attributes {dimension_semantics = [], scalar_prefetch = 0 : i64, scratch_operands = 0 : i64, tpu.core_type = #tpu.core_type<tc>} {
    %c0 = arith.constant 0 : index
    %c0_0 = arith.constant 0 : index
    %0 = vector.load %arg0[%c0, %c0_0] : memref<8x16xf32, #tpu.memory_space<vmem>>, vector<8x16xf32>
    %c0_1 = arith.constant 0 : index
    %c0_2 = arith.constant 0 : index
    %c0_3 = arith.constant 0 : index
    %1 = vector.load %arg1[%c0_1, %c0_2, %c0_3] : memref<2x128x128xbf16, #tpu.memory_space<vmem>>, vector<1x16x128xbf16>
    %2 = vector.shape_cast %1 : vector<1x16x128xbf16> to vector<16x128xbf16>
    %c0_4 = arith.constant 0 : index
    %c0_5 = arith.constant 0 : index
    %c0_6 = arith.constant 0 : index
    %3 = vector.load %arg2[%c0_4, %c0_5, %c0_6] : memref<2x3x128xf32, #tpu.memory_space<vmem>>, vector<1x3x128xf32>
    %4 = vector.shape_cast %3 : vector<1x3x128xf32> to vector<3x128xf32>
    %5 = vector.extract_strided_slice %4 {offsets = [0, 0], sizes = [1, 128], strides = [1, 1]} : vector<3x128xf32> to vector<1x128xf32>
    %6 = arith.truncf %0 : vector<8x16xf32> to vector<8x16xbf16>
    %cst = arith.constant dense<0.000000e+00> : vector<8x128xf32>
    %7 = tpu.matmul %6, %2, %cst {dimension_numbers = #tpu.dot_dimension_numbers<[1], [0], [0], [1], [0, 0, 1, 1], [], []>} : vector<8x16xbf16>, vector<16x128xbf16>, vector<8x128xf32> -> vector<8x128xf32>
    %8 = vector.broadcast %5 : vector<1x128xf32> to vector<8x128xf32>
    %9 = arith.addf %7, %8 : vector<8x128xf32>
    %cst_7 = arith.constant 0.000000e+00 : f32
    %10 = vector.broadcast %cst_7 : f32 to vector<8x128xf32>
    %11 = arith.cmpf oge, %9, %10 : vector<8x128xf32>
    %cst_8 = arith.constant 2.000000e-01 : f32
    %12 = vector.broadcast %cst_8 : f32 to vector<8x128xf32>
    %13 = arith.mulf %12, %9 : vector<8x128xf32>
    %14 = arith.select %11, %9, %13 : vector<8x128xi1>, vector<8x128xf32>
    %15 = vector.extract_strided_slice %4 {offsets = [1, 0], sizes = [1, 128], strides = [1, 1]} : vector<3x128xf32> to vector<1x128xf32>
    %16 = vector.extract_strided_slice %4 {offsets = [2, 0], sizes = [1, 128], strides = [1, 1]} : vector<3x128xf32> to vector<1x128xf32>
    %cst_9 = arith.constant dense<0.000000e+00> : vector<128xf32>
    %17 = vector.multi_reduction <add>, %14, %cst_9 [0] : vector<8x128xf32> to vector<128xf32>
    %18 = vector.shape_cast %17 : vector<128xf32> to vector<1x128xf32>
    %cst_10 = arith.constant 8.000000e+00 : f32
    %19 = vector.broadcast %cst_10 : f32 to vector<1x128xf32>
    %20 = arith.divf %18, %19 : vector<1x128xf32>
    %21 = vector.broadcast %20 : vector<1x128xf32> to vector<8x128xf32>
    %22 = arith.subf %14, %21 : vector<8x128xf32>
    %23 = arith.mulf %22, %22 : vector<8x128xf32>
    %cst_11 = arith.constant dense<0.000000e+00> : vector<128xf32>
    %24 = vector.multi_reduction <add>, %23, %cst_11 [0] : vector<8x128xf32> to vector<128xf32>
    %25 = vector.shape_cast %24 : vector<128xf32> to vector<1x128xf32>
    %cst_12 = arith.constant 8.000000e+00 : f32
    %26 = vector.broadcast %cst_12 : f32 to vector<1x128xf32>
    %27 = arith.divf %25, %26 : vector<1x128xf32>
    %cst_13 = arith.constant 9.99999974E-6 : f32
    %28 = vector.broadcast %cst_13 : f32 to vector<1x128xf32>
    %29 = arith.addf %27, %28 : vector<1x128xf32>
    %30 = math.rsqrt %29 : vector<1x128xf32>
    %31 = arith.mulf %15, %30 : vector<1x128xf32>
    %32 = vector.broadcast %31 : vector<1x128xf32> to vector<8x128xf32>
    %33 = arith.mulf %22, %32 : vector<8x128xf32>
    %34 = vector.broadcast %16 : vector<1x128xf32> to vector<8x128xf32>
    %35 = arith.addf %33, %34 : vector<8x128xf32>
    %c1 = arith.constant 1 : index
    %c0_14 = arith.constant 0 : index
    %c0_15 = arith.constant 0 : index
    %36 = vector.load %arg1[%c1, %c0_14, %c0_15] : memref<2x128x128xbf16, #tpu.memory_space<vmem>>, vector<1x128x128xbf16>
    %37 = vector.shape_cast %36 : vector<1x128x128xbf16> to vector<128x128xbf16>
    %c1_16 = arith.constant 1 : index
    %c0_17 = arith.constant 0 : index
    %c0_18 = arith.constant 0 : index
    %38 = vector.load %arg2[%c1_16, %c0_17, %c0_18] : memref<2x3x128xf32, #tpu.memory_space<vmem>>, vector<1x3x128xf32>
    %39 = vector.shape_cast %38 : vector<1x3x128xf32> to vector<3x128xf32>
    %40 = vector.extract_strided_slice %39 {offsets = [0, 0], sizes = [1, 128], strides = [1, 1]} : vector<3x128xf32> to vector<1x128xf32>
    %41 = arith.truncf %35 : vector<8x128xf32> to vector<8x128xbf16>
    %cst_19 = arith.constant dense<0.000000e+00> : vector<8x128xf32>
    %42 = tpu.matmul %41, %37, %cst_19 {dimension_numbers = #tpu.dot_dimension_numbers<[1], [0], [0], [1], [0, 0, 1, 1], [], []>} : vector<8x128xbf16>, vector<128x128xbf16>, vector<8x128xf32> -> vector<8x128xf32>
    %43 = vector.broadcast %40 : vector<1x128xf32> to vector<8x128xf32>
    %44 = arith.addf %42, %43 : vector<8x128xf32>
    %cst_20 = arith.constant 0.000000e+00 : f32
    %45 = vector.broadcast %cst_20 : f32 to vector<8x128xf32>
    %46 = arith.cmpf oge, %44, %45 : vector<8x128xf32>
    %cst_21 = arith.constant 2.000000e-01 : f32
    %47 = vector.broadcast %cst_21 : f32 to vector<8x128xf32>
    %48 = arith.mulf %47, %44 : vector<8x128xf32>
    %49 = arith.select %46, %44, %48 : vector<8x128xi1>, vector<8x128xf32>
    %50 = vector.extract_strided_slice %39 {offsets = [1, 0], sizes = [1, 128], strides = [1, 1]} : vector<3x128xf32> to vector<1x128xf32>
    %51 = vector.extract_strided_slice %39 {offsets = [2, 0], sizes = [1, 128], strides = [1, 1]} : vector<3x128xf32> to vector<1x128xf32>
    %cst_22 = arith.constant dense<0.000000e+00> : vector<128xf32>
    %52 = vector.multi_reduction <add>, %49, %cst_22 [0] : vector<8x128xf32> to vector<128xf32>
    %53 = vector.shape_cast %52 : vector<128xf32> to vector<1x128xf32>
    %cst_23 = arith.constant 8.000000e+00 : f32
    %54 = vector.broadcast %cst_23 : f32 to vector<1x128xf32>
    %55 = arith.divf %53, %54 : vector<1x128xf32>
    %56 = vector.broadcast %55 : vector<1x128xf32> to vector<8x128xf32>
    %57 = arith.subf %49, %56 : vector<8x128xf32>
    %58 = arith.mulf %57, %57 : vector<8x128xf32>
    %cst_24 = arith.constant dense<0.000000e+00> : vector<128xf32>
    %59 = vector.multi_reduction <add>, %58, %cst_24 [0] : vector<8x128xf32> to vector<128xf32>
    %60 = vector.shape_cast %59 : vector<128xf32> to vector<1x128xf32>
    %cst_25 = arith.constant 8.000000e+00 : f32
    %61 = vector.broadcast %cst_25 : f32 to vector<1x128xf32>
    %62 = arith.divf %60, %61 : vector<1x128xf32>
    %cst_26 = arith.constant 9.99999974E-6 : f32
    %63 = vector.broadcast %cst_26 : f32 to vector<1x128xf32>
    %64 = arith.addf %62, %63 : vector<1x128xf32>
    %65 = math.rsqrt %64 : vector<1x128xf32>
    %66 = arith.mulf %50, %65 : vector<1x128xf32>
    %67 = vector.broadcast %66 : vector<1x128xf32> to vector<8x128xf32>
    %68 = arith.mulf %57, %67 : vector<8x128xf32>
    %69 = vector.broadcast %51 : vector<1x128xf32> to vector<8x128xf32>
    %70 = arith.addf %68, %69 : vector<8x128xf32>
    %71 = vector.extract_strided_slice %70 {offsets = [0, 0], sizes = [8, 8], strides = [1, 1]} : vector<8x128xf32> to vector<8x8xf32>
    %c0_27 = arith.constant 0 : index
    %c0_28 = arith.constant 0 : index
    %72 = vector.load %arg3[%c0_27, %c0_28] : memref<8x8xf32, #tpu.memory_space<vmem>>, vector<8x8xf32>
    tpu.vector_store %arg3[%c0_27, %c0_28], %71 {strides = array<i32>} : memref<8x8xf32, #tpu.memory_space<vmem>>, vector<8x8xf32>,
    return
  }
}

</mosaic_0001>

<bundles_post_ra>
// kernel: tpu_custom_call.1
= control target key start
LH: loop header
LB: loop body
LE: loop exit
PB: predicated region body
PF: predicated region fallthrough
CT: control target
= control target key end

     0   :  { %8 = vsyncpa [#allocation3], 0  ;;  %s462_s0 = inlined_call_operand.vmem [shape: f32[8,16], index: 0, kind: input, shape index: {}]   ;;  %s463_s1 = inlined_call_operand.hbm [shape: bf16[2,128,128], index: 1, kind: input, shape index: {}]   ;;  %s464_s2 = inlined_call_operand.vmem [shape: f32[2,3,128], index: 2, kind: input, shape index: {}]   ;;  %s465_s3 = inlined_call_operand.hbm [shape: f32[8,8], index: 3, kind: output, shape index: {}]  }
   0x1   :  { %9 = vsyncpa [#allocation4], 0  ;;  %s398_s12 = smov [#allocation2]   ;;  %s350_s16 = scalar_lea.hbm %s463_s1, 2048 }
   0x2   :  { %s17_s13 = sshll.u32 %s398_s12, 4  ;;  %p351_p0 = scmp.ne.s32.totalorder %s463_s1, %s350_s16  ;;  %s18_s13 = int_to_ptr.vmem [resolvable:$true] %s17_s13 }
   0x3   :  { %p354_p1 = scmp.lt.u32.totalorder %s350_s16, %s463_s1 }
   0x5   :  { %p356_p2 = pnand %p354_p1, %p351_p0 }
   0x7   :  { %359 = shalt.err (!%p356_p2)
}
   0x8   :  { %s360_s21 = scalar_lea.vmem %s18_s13, 2048  ;;  %p365_p4 = scmp.lt.s32.totalorder %s18_s13, %s18_s13 }
   0x9   :  { %p361_p3 = scmp.ne.s32.totalorder %s18_s13, %s360_s21  ;;  %p366_p5 = scmp.lt.s32.totalorder %s360_s21, %s360_s21 }
   0xb   :  { %p367_p6 = por %p366_p5, %p365_p4 }
   0xd   :  { %p368_p7 = pnand %p367_p6, %p361_p3 }
   0xf   :  { %371 = shalt.err (!%p368_p7)
}
  0x10   :  { %s399_s22 = smov 64   ;;  %s400_s23 = smov 4  }
  0x11   :  { %23 = dma.hbm_to_vmem [thread:$0]  %s463_s1, 2048, %s18_s13, [#allocation3], %s399_s22, %s399_s22, %s400_s23  }
  0x12   :  { %394 = dma.done.wait [#allocation3], 2048  }
  0x13   :  { %395 = vsyncadd [#allocation3], 4294965248  ;;  %v401_v0 = vmov 0.0   ;;  %vm402_vm0 = vmmov 0   ;;  %v337_v1 = vld [vmem:[#allocation2] sm:$0xff]   ;;  %vm45_vm1 = vcmask 130048   ;;  %v35_v12 = vlaneseq }
  0x14   :  { %305 = vmatprep.subr.bf16.mxu0 %v401_v0  ;;  %307 = vmatprep.mubr.msk.bf16.mxu0 %vm402_vm0, %v401_v0  ;;  %v30_v2 = vld [vmem:[%s462_s0] sm:$0xff]  ;;  %v339_v5 = vld [vmem:[#allocation2 + $0x48] sm:$0xff]   ;;  %v340_v6 = vld [vmem:[#allocation2 + $0x50] sm:$0xff]   ;;  %vm266_vm4 = vcmask 64512  }
  0x15   :  { %311 = vmatprep.subr.bf16.mxu1 %v401_v0  ;;  %327 = vmatprep.mubr.msk.bf16.mxu1 %vm402_vm0, %v401_v0  ;;  %v34_v3 = vpack.c.bf16 %v30_v2, %v30_v2  ;;  %v338_v4 = vld [vmem:[#allocation2 + $0x40] sm:$0xff]   ;;  %v341_v7 = vld [vmem:[#allocation2 + $0x58] sm:$0xff]   ;;  %v343_v9 = vld [vmem:[#allocation2 + $0x68] sm:$0xff]   ;;  %v439_v13 = vshrl.u32 %v35_v12, 7 }
  0x16   :  { %306 = vmatpush3.bf16.msra.mxu0 %v337_v1  ;;  %312 = vmatpush3.bf16.msra.mxu1 %v338_v4  ;;  %v342_v8 = vld [vmem:[#allocation2 + $0x60] sm:$0xff]   ;;  %v344_v10 = vld [vmem:[#allocation2 + $0x70] sm:$0xff]   ;;  %v345_v11 = vld [vmem:[#allocation2 + $0x78] sm:$0xff]  }
  0x17   :  { %313 = vmatprep.subr.bf16.mxu1 %v401_v0  ;;  %v37_v14 = vsub.s32 0, %v439_v13  ;;  %v33_v15 = vld [vmem:[%s464_s2] sm:$0x7]  ;;  %v114_v41 = vsub.s32 1, %v439_v13  ;;  %v119_v42 = vsub.s32 2, %v439_v13 }
  0x18   :  { %v285_v50 = vld [vmem:[%s464_s2 + $0x4] sm:$0x7]  ;;  %s403_s2 = smov [#allocation5]  }
  0x19   :  { %308 = vmatmul.mubr.msk.bf16.vlgmr.msra.gmra.mrb[0].mxu0 %vm45_vm1, %v34_v3  ;;  %v38_v16 = vrot.slane %v33_v15, %v37_v14  ;;  %v120_v46 = vrot.slane %v33_v15, %v119_v42  ;;  %v145_v51 = vrot.slane %v285_v50, %v37_v14  ;;  %s274_s30 = sshll.u32 %s403_s2, 4  ;;  %s275_s30 = int_to_ptr.vmem [resolvable:$true] %s274_s30 }
  0x1a   :  { %314 = vmatpush3.bf16.msra.mxu1 %v339_v5  ;;  %s372_s4 = scalar_lea.vmem %s275_s30, 128  ;;  %p377_p9 = scmp.lt.s32.totalorder %s275_s30, %s275_s30 }
  0x1b   :  { %315 = vmatprep.subr.bf16.mxu1 %v401_v0  ;;  %p373_p8 = scmp.ne.s32.totalorder %s275_s30, %s372_s4  ;;  %p378_p10 = scmp.lt.s32.totalorder %s372_s4, %s372_s4 }
  0x1d   :  { %p379_p11 = por %p378_p10, %p377_p9 }
  0x1e   :  { %316 = vmatpush3.bf16.msra.mxu1 %v340_v6 }
  0x1f   :  { %317 = vmatprep.subr.bf16.mxu1 %v401_v0  ;;  %p380_p12 = pnand %p379_p11, %p373_p8 }
  0x22   :  { %318 = vmatpush3.bf16.msra.mxu1 %v341_v7 }
  0x23   :  { %319 = vmatprep.subr.bf16.mxu1 %v401_v0 }
  0x26   :  { %320 = vmatpush3.bf16.msra.mxu1 %v342_v8 }
  0x27   :  { %321 = vmatprep.subr.bf16.mxu1 %v401_v0 }
  0x2a   :  { %322 = vmatpush3.bf16.msra.mxu1 %v343_v9 }
  0x2b   :  { %323 = vmatprep.subr.bf16.mxu1 %v401_v0 }
  0x2e   :  { %324 = vmatpush3.bf16.msra.mxu1 %v344_v10 }
  0x2f   :  { %325 = vmatprep.subr.bf16.mxu1 %v401_v0 }
  0x32   :  { %326 = vmatpush3.bf16.msra.mxu1 %v345_v11 }
  0xec   :  { %v83_v17 = vpop.f32.mrb[0].mxu0 }
  0xed   :  { %v84_v18 = vadd.f32 %v83_v17, %v38_v16  ;;  %v309_v19 = vpop.f32.mrb[1].mxu0 }
  0xee   :  { %v86_v20 = vpop.f32.mrb[2].mxu0 }
  0xef   :  { %vm89_vm2 = vcmp.ge.f32.partialorder %v84_v18, 0.0  ;;  %v90_v21 = vmul.f32 0.2, %v84_v18  ;;  %v310_v22 = vpop.f32.mrb[3].mxu0 }
  0xf1   :  { %v91_v23 = vsel %vm89_vm2, %v84_v18, %v90_v21 }
  0xf2   :  { %v92_v24 = vrot.slane %v91_v23, 4 }
  0xf4   :  { %v93_v25 = vadd.f32 %v92_v24, %v91_v23 }
  0xf6   :  { %v94_v26 = vrot.slane %v93_v25, 2 }
  0xf8   :  { %v95_v27 = vadd.f32 %v94_v26, %v93_v25 }
  0xfa   :  { %v96_v28 = vrot.slane %v95_v27, 1 }
  0xfc   :  { %v97_v29 = vadd.f32 %v96_v28, %v95_v27 }
  0xfe   :  { %v99_v30 = vmul.f32 0.125, %v97_v29 }
 0x100   :  { %v100_v31 = vsub.f32 %v91_v23, %v99_v30 }
 0x102   :  { %v101_v32 = vmul.f32 %v100_v31, %v100_v31 }
 0x104   :  { %v102_v33 = vrot.slane %v101_v32, 4 }
 0x106   :  { %v103_v34 = vadd.f32 %v102_v33, %v101_v32 }
 0x108   :  { %v104_v35 = vrot.slane %v103_v34, 2 }
 0x10a   :  { %v105_v36 = vadd.f32 %v104_v35, %v103_v34 }
 0x10c   :  { %v106_v37 = vrot.slane %v105_v36, 1 }
 0x10e   :  { %v107_v38 = vadd.f32 %v106_v37, %v105_v36 }
 0x110   :  { %v108_v39 = vmul.f32 0.125, %v107_v38 }
 0x112   :  { %v109_v40 = vadd.f32 1e-05, %v108_v39 }
 0x114   :  { %346 = vrsqrt.f32 %v109_v40 }
 0x11e   :  { %v347_v43 = vpop.eup %346 }
 0x11f   :  { %v111_v44 = vmul.f32 %v347_v43, %v33_v15  ;;  %v264_v15 = vrot.slane %v285_v50, %v119_v42 }
 0x121   :  { %v115_v45 = vrot.slane %v111_v44, %v114_v41 }
 0x123   :  { %v116_v47 = vmul.f32 %v115_v45, %v100_v31 }
 0x125   :  { %v121_v48 = vadd.f32 %v120_v46, %v116_v47 }
 0x127   :  { %v141_v49 = vpack.c.bf16 %v121_v48, %v121_v48 }
 0x129   :  { %328 = vmatmul.mubr.bf16.vlgmr.msra.gmra.mrb[0].mxu1 %v141_v49 }
 0x1fc   :  { %v228_v52 = vpop.f32.mrb[0].mxu1 }
 0x1fd   :  { %v229_v53 = vadd.f32 %v228_v52, %v145_v51  ;;  %v329_v54 = vpop.f32.mrb[1].mxu1 }
 0x1fe   :  { %v231_v55 = vpop.f32.mrb[2].mxu1 }
 0x1ff   :  { %vm234_vm3 = vcmp.ge.f32.partialorder %v229_v53, 0.0  ;;  %v235_v56 = vmul.f32 0.2, %v229_v53  ;;  %v330_v57 = vpop.f32.mrb[3].mxu1 }
 0x201   :  { %v236_v58 = vsel %vm234_vm3, %v229_v53, %v235_v56 }
 0x202   :  { %v237_v59 = vrot.slane %v236_v58, 4 }
 0x204   :  { %v238_v60 = vadd.f32 %v237_v59, %v236_v58 }
 0x206   :  { %v239_v61 = vrot.slane %v238_v60, 2 }
 0x208   :  { %v240_v62 = vadd.f32 %v239_v61, %v238_v60 }
 0x20a   :  { %v241_v63 = vrot.slane %v240_v62, 1 }
 0x20c   :  { %v242_v0 = vadd.f32 %v241_v63, %v240_v62 }
 0x20e   :  { %v243_v1 = vmul.f32 0.125, %v242_v0 }
 0x210   :  { %v244_v2 = vsub.f32 %v236_v58, %v243_v1 }
 0x212   :  { %v245_v3 = vmul.f32 %v244_v2, %v244_v2 }
 0x214   :  { %v246_v4 = vrot.slane %v245_v3, 4 }
 0x216   :  { %v247_v5 = vadd.f32 %v246_v4, %v245_v3 }
 0x218   :  { %v248_v6 = vrot.slane %v247_v5, 2 }
 0x21a   :  { %v249_v7 = vadd.f32 %v248_v6, %v247_v5 }
 0x21c   :  { %v250_v8 = vrot.slane %v249_v7, 1 }
 0x21e   :  { %v251_v9 = vadd.f32 %v250_v8, %v249_v7 }
 0x220   :  { %v252_v10 = vmul.f32 0.125, %v251_v9 }
 0x222   :  { %v253_v11 = vadd.f32 1e-05, %v252_v10 }
 0x224   :  { %348 = vrsqrt.f32 %v253_v11 }
 0x22e   :  { %v349_v12 = vpop.eup %348 }
 0x22f   :  { %v255_v13 = vmul.f32 %v349_v12, %v285_v50 }
 0x231   :  { %v259_v14 = vrot.slane %v255_v13, %v114_v41 }
 0x233   :  { %v260_v16 = vmul.f32 %v259_v14, %v244_v2 }
 0x235   :  { %v265_v17 = vadd.f32 %v264_v15, %v260_v16 }
 0x237   :  { %267 = vst.msk [vmem:[#allocation5] sm:$0xff] %vm266_vm4, %v265_v17 }
 0x238   :  { %383 = shalt.err (!%p380_p12)
}
 0x239   :  { %s384_s7 = scalar_lea.hbm %s465_s3, 128 }
 0x23a   :  { %p385_p13 = scmp.ne.s32.totalorder %s465_s3, %s384_s7  ;;  %p388_p0 = scmp.lt.u32.totalorder %s384_s7, %s465_s3 }
 0x23c   :  { %p390_p1 = pnand %p388_p0, %p385_p13 }
 0x23e   :  { %393 = shalt.err (!%p390_p1)
}
 0x23f   :  { %277 = dma.vmem_to_hbm [thread:$0]  %s275_s30, 128, %s465_s3, [#allocation4]  }
 0x240   :  { %396 = dma.done.wait [#allocation4], 128  }
 0x241   :  { %397 = vsyncadd [#allocation4], 4294967168 }
 0x242   :  { %281 = vsyncpa [#allocation3], 1 }
 0x243   :  { %282 = vsyncpa [#allocation4], 1 }

</bundles_post_ra>
